<compile_context>
chip_gen: v5e
topology: v5e:2x2
jax: 0.10.0
libtpu: 0.0.40
codegen_flags: <defaults>
</compile_context>

<pallas_src>
import jax
import jax.numpy as jnp
from jax.experimental import pallas as pl
from jax.experimental.pallas import tpu as pltpu

IN_DIM = 32     # cfg.IN_MOL_DIM  (synthetic)
OUT_DIM = 8     # cfg.PREDICTION_DIM (synthetic)
H1 = 128
H2 = 64

LANE = 128
H2_PAD = ((H2 + LANE - 1) // LANE) * LANE        # 128
OUT_PAD = ((OUT_DIM + LANE - 1) // LANE) * LANE  # 128


def _round_up(n, m):
    return ((n + m - 1) // m) * m


def _silu_f32(x):
    # x * sigmoid(x); exp + approx reciprocal both land on the EUP slot.
    return x * pl.reciprocal(1.0 + jnp.exp(-x), approx=True)


def mlp_kernel(x_ref, w1_ref, b1_ref, w2_ref, b2_ref, w3_ref, b3_ref, o_ref):
    # x tile arrives as f32; cast to bf16 in-register for the MXU.
    x = x_ref[...].astype(jnp.bfloat16)                         # (TB, IN_DIM)
    # Linear(in_dim, 128) + SiLU   (bf16 MXU, f32 accumulate / activation)
    h = jnp.dot(x, w1_ref[...], preferred_element_type=jnp.float32) + b1_ref[...]
    h = _silu_f32(h)
    # Linear(128, 64->128 padded) + SiLU  (padded cols stay exactly 0)
    h = jnp.dot(h.astype(jnp.bfloat16), w2_ref[...],
                preferred_element_type=jnp.float32) + b2_ref[...]
    h = _silu_f32(h)
    # Linear(64, out_dim->128 padded); only the first OUT_DIM lanes are real.
    h = jnp.dot(h.astype(jnp.bfloat16), w3_ref[...],
                preferred_element_type=jnp.float32) + b3_ref[...]
    # Store only the valid columns; (tb, 8) tile is contiguous in HBM.
    o_ref[...] = h[:, :OUT_DIM].astype(o_ref.dtype)


def baseline_mlp(x, w1, b1, w2, b2, w3, b3, *, tile_b=1024):
    """x: (B, IN_DIM) f32.  Weights stored (in_features, out_features)."""
    B = x.shape[0]
    tb = _round_up(min(tile_b, _round_up(B, 8)), 8)   # row tile (sublane aligned)
    B_pad = _round_up(B, tb)
    grid = (B_pad // tb,)

    # Wrapper-side layout plumbing (weights are tiny; x is only touched if a
    # ragged batch needs row padding).
    x_p = x if B_pad == B else jnp.pad(x, ((0, B_pad - B), (0, 0)))
    w1_b = w1.astype(jnp.bfloat16)
    b1_f = b1.astype(jnp.float32)
    w2_p = jnp.pad(w2, ((0, 0), (0, H2_PAD - H2))).astype(jnp.bfloat16)
    b2_p = jnp.pad(b2, ((0, 0), (0, H2_PAD - H2))).astype(jnp.float32)
    w3_p = jnp.pad(w3, ((0, H2_PAD - H2), (0, OUT_PAD - OUT_DIM))).astype(jnp.bfloat16)
    b3_p = jnp.pad(b3, ((0, 0), (0, OUT_PAD - OUT_DIM))).astype(jnp.float32)

    resident = lambda i: (0, 0)   # weights/biases: same block every grid step

    out = pl.pallas_call(
        mlp_kernel,
        out_shape=jax.ShapeDtypeStruct((B_pad, OUT_DIM), jnp.float32),
        grid_spec=pltpu.PrefetchScalarGridSpec(
            num_scalar_prefetch=0,
            grid=grid,
            in_specs=[
                pl.BlockSpec((tb, IN_DIM), lambda i: (i, 0)),   # x tile (pipelined)
                pl.BlockSpec((IN_DIM, H1), resident),           # w1
                pl.BlockSpec((1, H1), resident),                # b1
                pl.BlockSpec((H1, H2_PAD), resident),           # w2
                pl.BlockSpec((1, H2_PAD), resident),            # b2
                pl.BlockSpec((H2_PAD, OUT_PAD), resident),      # w3
                pl.BlockSpec((1, OUT_PAD), resident),           # b3
            ],
            out_specs=pl.BlockSpec((tb, OUT_DIM), lambda i: (i, 0)),
        ),
        compiler_params=pltpu.CompilerParams(
            dimension_semantics=("parallel",),        # 2 TCs on v7x; no-op v5e/v6e
            vmem_limit_bytes=32 * 1024 * 1024,        # safe on 64 MiB v7x VMEM
        ),
    )(x_p, w1_b, b1_f, w2_p, b2_p, w3_p, b3_p)

    return out if B_pad == B else out[:B]


def init_params(key):
    """Deterministic init mimicking torch.nn.Linear (U[-1/sqrt(fan_in), 1/sqrt(fan_in)])."""
    ks = jax.random.split(key, 6)

    def linear(kw, kb, fan_in, fan_out):
        bound = 1.0 / jnp.sqrt(fan_in)
        w = jax.random.uniform(kw, (fan_in, fan_out), jnp.float32, -bound, bound)
        b = jax.random.uniform(kb, (1, fan_out), jnp.float32, -bound, bound)
        return w, b

    w1, b1 = linear(ks[0], ks[1], IN_DIM, H1)
    w2, b2 = linear(ks[2], ks[3], H1, H2)
    w3, b3 = linear(ks[4], ks[5], H2, OUT_DIM)
    return w1, b1, w2, b2, w3, b3


def reference_mlp(x, w1, b1, w2, b2, w3, b3):
    def silu(v):
        return v * jax.nn.sigmoid(v)
    h = silu(x @ w1 + b1)
    h = silu(h @ w2 + b2)
    return h @ w3 + b3


if __name__ == "__main__":
    key = jax.random.PRNGKey(0)
    k_x, k_x2, k_p = jax.random.split(key, 3)
    params = init_params(k_p)

    # Small check (batch.u -> (B, IN_DIM) feature matrix).
    B = 8
    x = jax.random.normal(k_x, (B, IN_DIM), jnp.float32)
    out = jax.block_until_ready(baseline_mlp(x, *params))
    ref = reference_mlp(x, *params)
    assert out.shape == (B, OUT_DIM), out.shape
    # bf16 MXU inputs + approx reciprocal -> relaxed tolerance vs f32 reference.
    assert jnp.allclose(out, ref, atol=5e-2, rtol=5e-2), "mismatch vs reference (B=8)"

    # Exercise the batch grid + ragged-batch padding path (3 grid steps).
    B2 = 300
    x2 = jax.random.normal(k_x2, (B2, IN_DIM), jnp.float32)
    out2 = jax.block_until_ready(baseline_mlp(x2, *params, tile_b=128))
    ref2 = reference_mlp(x2, *params)
    assert out2.shape == (B2, OUT_DIM), out2.shape
    assert jnp.allclose(out2, ref2, atol=5e-2, rtol=5e-2), "mismatch vs reference (B=300)"

    print("KERNEL_OK")
</pallas_src>

<mosaic_0001>
module attributes {stable_mosaic.version = 11 : i64} {
  func.func @mlp_kernel(%arg0: i32, %arg1: memref<8x32xf32, #tpu.memory_space<vmem>>, %arg2: memref<32x128xbf16, #tpu.memory_space<vmem>>, %arg3: memref<1x128xf32, #tpu.memory_space<vmem>>, %arg4: memref<128x128xbf16, #tpu.memory_space<vmem>>, %arg5: memref<1x128xf32, #tpu.memory_space<vmem>>, %arg6: memref<128x128xbf16, #tpu.memory_space<vmem>>, %arg7: memref<1x128xf32, #tpu.memory_space<vmem>>, %arg8: memref<8x8xf32, #tpu.memory_space<vmem>>) attributes {dimension_semantics = [#tpu.dimension_semantics<parallel>], iteration_bounds = array<i64: 1>, scalar_prefetch = 0 : i64, scratch_operands = 0 : i64, tpu.core_type = #tpu.core_type<tc>, window_params = [{transform_indices = @transform_0, window_bounds = array<i64: 8, 32>}, {pipeline_mode = #tpu.pipeline_mode<synchronous>, transform_indices = @transform_1, window_bounds = array<i64: 32, 128>}, {pipeline_mode = #tpu.pipeline_mode<synchronous>, transform_indices = @transform_2, window_bounds = array<i64: 1, 128>}, {pipeline_mode = #tpu.pipeline_mode<synchronous>, transform_indices = @transform_3, window_bounds = array<i64: 128, 128>}, {pipeline_mode = #tpu.pipeline_mode<synchronous>, transform_indices = @transform_4, window_bounds = array<i64: 1, 128>}, {pipeline_mode = #tpu.pipeline_mode<synchronous>, transform_indices = @transform_5, window_bounds = array<i64: 128, 128>}, {pipeline_mode = #tpu.pipeline_mode<synchronous>, transform_indices = @transform_6, window_bounds = array<i64: 1, 128>}, {transform_indices = @transform_7, window_bounds = array<i64: 8, 8>}]} {
    %c0 = arith.constant 0 : index
    %c0_0 = arith.constant 0 : index
    %0 = vector.load %arg1[%c0, %c0_0] : memref<8x32xf32, #tpu.memory_space<vmem>>, vector<8x32xf32>
    %1 = arith.truncf %0 : vector<8x32xf32> to vector<8x32xbf16>
    %c0_1 = arith.constant 0 : index
    %c0_2 = arith.constant 0 : index
    %2 = vector.load %arg2[%c0_1, %c0_2] : memref<32x128xbf16, #tpu.memory_space<vmem>>, vector<32x128xbf16>
    %cst = arith.constant dense<0.000000e+00> : vector<8x128xf32>
    %3 = tpu.matmul %1, %2, %cst {dimension_numbers = #tpu.dot_dimension_numbers<[1], [0], [0], [1], [0, 0, 1, 1], [], []>} : vector<8x32xbf16>, vector<32x128xbf16>, vector<8x128xf32> -> vector<8x128xf32>
    %c0_3 = arith.constant 0 : index
    %c0_4 = arith.constant 0 : index
    %4 = vector.load %arg3[%c0_3, %c0_4] : memref<1x128xf32, #tpu.memory_space<vmem>>, vector<1x128xf32>
    %5 = vector.broadcast %4 : vector<1x128xf32> to vector<8x128xf32>
    %6 = arith.addf %3, %5 : vector<8x128xf32>
    %cst_5 = arith.constant 0.000000e+00 : f32
    %7 = vector.broadcast %cst_5 : f32 to vector<8x128xf32>
    %8 = arith.subf %7, %6 : vector<8x128xf32>
    %9 = math.exp %8 : vector<8x128xf32>
    %cst_6 = arith.constant 1.000000e+00 : f32
    %10 = vector.broadcast %cst_6 : f32 to vector<8x128xf32>
    %11 = arith.addf %10, %9 : vector<8x128xf32>
    %12 = tpu.reciprocal %11 {approx = true} : vector<8x128xf32> -> vector<8x128xf32>
    %13 = arith.mulf %6, %12 : vector<8x128xf32>
    %14 = arith.truncf %13 : vector<8x128xf32> to vector<8x128xbf16>
    %c0_7 = arith.constant 0 : index
    %c0_8 = arith.constant 0 : index
    %15 = vector.load %arg4[%c0_7, %c0_8] : memref<128x128xbf16, #tpu.memory_space<vmem>>, vector<128x128xbf16>
    %cst_9 = arith.constant dense<0.000000e+00> : vector<8x128xf32>
    %16 = tpu.matmul %14, %15, %cst_9 {dimension_numbers = #tpu.dot_dimension_numbers<[1], [0], [0], [1], [0, 0, 1, 1], [], []>} : vector<8x128xbf16>, vector<128x128xbf16>, vector<8x128xf32> -> vector<8x128xf32>
    %c0_10 = arith.constant 0 : index
    %c0_11 = arith.constant 0 : index
    %17 = vector.load %arg5[%c0_10, %c0_11] : memref<1x128xf32, #tpu.memory_space<vmem>>, vector<1x128xf32>
    %18 = vector.broadcast %17 : vector<1x128xf32> to vector<8x128xf32>
    %19 = arith.addf %16, %18 : vector<8x128xf32>
    %cst_12 = arith.constant 0.000000e+00 : f32
    %20 = vector.broadcast %cst_12 : f32 to vector<8x128xf32>
    %21 = arith.subf %20, %19 : vector<8x128xf32>
    %22 = math.exp %21 : vector<8x128xf32>
    %cst_13 = arith.constant 1.000000e+00 : f32
    %23 = vector.broadcast %cst_13 : f32 to vector<8x128xf32>
    %24 = arith.addf %23, %22 : vector<8x128xf32>
    %25 = tpu.reciprocal %24 {approx = true} : vector<8x128xf32> -> vector<8x128xf32>
    %26 = arith.mulf %19, %25 : vector<8x128xf32>
    %27 = arith.truncf %26 : vector<8x128xf32> to vector<8x128xbf16>
    %c0_14 = arith.constant 0 : index
    %c0_15 = arith.constant 0 : index
    %28 = vector.load %arg6[%c0_14, %c0_15] : memref<128x128xbf16, #tpu.memory_space<vmem>>, vector<128x128xbf16>
    %cst_16 = arith.constant dense<0.000000e+00> : vector<8x128xf32>
    %29 = tpu.matmul %27, %28, %cst_16 {dimension_numbers = #tpu.dot_dimension_numbers<[1], [0], [0], [1], [0, 0, 1, 1], [], []>} : vector<8x128xbf16>, vector<128x128xbf16>, vector<8x128xf32> -> vector<8x128xf32>
    %c0_17 = arith.constant 0 : index
    %c0_18 = arith.constant 0 : index
    %30 = vector.load %arg7[%c0_17, %c0_18] : memref<1x128xf32, #tpu.memory_space<vmem>>, vector<1x128xf32>
    %31 = vector.broadcast %30 : vector<1x128xf32> to vector<8x128xf32>
    %32 = arith.addf %29, %31 : vector<8x128xf32>
    %33 = vector.extract_strided_slice %32 {offsets = [0, 0], sizes = [8, 8], strides = [1, 1]} : vector<8x128xf32> to vector<8x8xf32>
    %c0_19 = arith.constant 0 : index
    %c0_20 = arith.constant 0 : index
    %34 = vector.load %arg8[%c0_19, %c0_20] : memref<8x8xf32, #tpu.memory_space<vmem>>, vector<8x8xf32>
    tpu.vector_store %arg8[%c0_19, %c0_20], %33 {strides = array<i32>} : memref<8x8xf32, #tpu.memory_space<vmem>>, vector<8x8xf32>,
    return
  }
  func.func @transform_0(%arg0: i32) -> (i32, i32) {
    %c0_i32 = arith.constant 0 : i32
    %c0_i32_0 = arith.constant 0 : i32
    return %arg0, %c0_i32 : i32, i32
  }
  func.func @transform_1(%arg0: i32) -> (i32, i32) {
    %c0_i32 = arith.constant 0 : i32
    %c0_i32_0 = arith.constant 0 : i32
    %c0_i32_1 = arith.constant 0 : i32
    return %c0_i32, %c0_i32_0 : i32, i32
  }
  func.func @transform_2(%arg0: i32) -> (i32, i32) {
    %c0_i32 = arith.constant 0 : i32
    %c0_i32_0 = arith.constant 0 : i32
    %c0_i32_1 = arith.constant 0 : i32
    return %c0_i32, %c0_i32_0 : i32, i32
  }
  func.func @transform_3(%arg0: i32) -> (i32, i32) {
    %c0_i32 = arith.constant 0 : i32
    %c0_i32_0 = arith.constant 0 : i32
    %c0_i32_1 = arith.constant 0 : i32
    return %c0_i32, %c0_i32_0 : i32, i32
  }
  func.func @transform_4(%arg0: i32) -> (i32, i32) {
    %c0_i32 = arith.constant 0 : i32
    %c0_i32_0 = arith.constant 0 : i32
    %c0_i32_1 = arith.constant 0 : i32
    return %c0_i32, %c0_i32_0 : i32, i32
  }
  func.func @transform_5(%arg0: i32) -> (i32, i32) {
    %c0_i32 = arith.constant 0 : i32
    %c0_i32_0 = arith.constant 0 : i32
    %c0_i32_1 = arith.constant 0 : i32
    return %c0_i32, %c0_i32_0 : i32, i32
  }
  func.func @transform_6(%arg0: i32) -> (i32, i32) {
    %c0_i32 = arith.constant 0 : i32
    %c0_i32_0 = arith.constant 0 : i32
    %c0_i32_1 = arith.constant 0 : i32
    return %c0_i32, %c0_i32_0 : i32, i32
  }
  func.func @transform_7(%arg0: i32) -> (i32, i32) {
    %c0_i32 = arith.constant 0 : i32
    %c0_i32_0 = arith.constant 0 : i32
    return %arg0, %c0_i32 : i32, i32
  }
}

</mosaic_0001>

<bundles_post_ra>
// kernel: tpu_custom_call.1
= control target key start
LH: loop header
LB: loop body
LE: loop exit
PB: predicated region body
PF: predicated region fallthrough
CT: control target
= control target key end

     0   :  { %12 = vsyncpa [#allocation3], 0  ;;  %s633_s0 = inlined_call_operand.hbm [shape: f32[8,32], index: 0, kind: input, shape index: {}]   ;;  %s634_s1 = inlined_call_operand.hbm [shape: bf16[32,128], index: 1, kind: input, shape index: {}]   ;;  %s635_s2 = inlined_call_operand.vmem [shape: f32[1,128], index: 2, kind: input, shape index: {}]   ;;  %s636_s3 = inlined_call_operand.hbm [shape: bf16[128,128], index: 3, kind: input, shape index: {}]   ;;  %s637_s4 = inlined_call_operand.vmem [shape: f32[1,128], index: 4, kind: input, shape index: {}]   ;;  %s638_s5 = inlined_call_operand.hbm [shape: bf16[128,128], index: 5, kind: input, shape index: {}]   ;;  %s639_s6 = inlined_call_operand.vmem [shape: f32[1,128], index: 6, kind: input, shape index: {}]   ;;  %s640_s7 = inlined_call_operand.hbm [shape: f32[8,8], index: 7, kind: output, shape index: {}]  }
   0x1   :  { %13 = vsyncpa [#allocation6], 0 }
   0x2   :  { %14 = vsyncpa [#allocation9], 0  ;;  %s31_s26 = sshll.u32 %s634_s1, 4  ;;  %s32_s26 = int_to_ptr.hbm [resolvable:$true] %s31_s26 }
   0x3   :  { %15 = vsyncpa [#allocation4], 0  ;;  %s562_s27 = smov [#allocation5]   ;;  %s21_s8 = sshll.u32 %s633_s0, 4  ;;  %s22_s8 = int_to_ptr.hbm [resolvable:$true] %s21_s8 }
   0x4   :  { %s33_s28 = sshll.u32 %s562_s27, 4  ;;  %s563_s9 = smov 64   ;;  %s34_s28 = int_to_ptr.vmem [resolvable:$true] %s33_s28 }
   0x5   :  { %s564_s10 = smov 4   ;;  %s565_s11 = smov [#allocation2]  }
   0x6   :  { %39 = dma.hbm_to_vmem [thread:$0]  %s32_s26, 256, %s34_s28, [#allocation6], %s563_s9, %s563_s9, %s564_s10  }
   0x7   :  { %s23_s12 = sshll.u32 %s565_s11, 4  ;;  %s46_s15 = sshll.u32 %s636_s3, 4  ;;  %s24_s12 = int_to_ptr.vmem [resolvable:$true] %s23_s12  ;;  %s47_s15 = int_to_ptr.hbm [resolvable:$true] %s46_s15 }
   0x8   :  { %26 = dma.hbm_to_vmem [thread:$0]  %s22_s8, 128, %s24_s12, [#allocation3]  }
   0x9   :  { %s61_s17 = sshll.u32 %s638_s5, 4  ;;  %s566_s18 = smov [#allocation7]   ;;  %s62_s17 = int_to_ptr.hbm [resolvable:$true] %s61_s17 }
   0xa   :  { %s48_s19 = sshll.u32 %s566_s18, 4  ;;  %s567_s0 = smov [#allocation8]   ;;  %s49_s19 = int_to_ptr.vmem [resolvable:$true] %s48_s19 }
   0xb   :  { %54 = dma.hbm_to_vmem [thread:$0]  %s47_s15, 1024, %s49_s19, [#allocation6], %s563_s9, %s563_s9, %s564_s10  }
   0xc   :  { %s63_s20 = sshll.u32 %s567_s0, 4  ;;  %s64_s20 = int_to_ptr.vmem [resolvable:$true] %s63_s20 }
   0xd   :  { %69 = dma.hbm_to_vmem [thread:$0]  %s62_s17, 1024, %s64_s20, [#allocation9], %s563_s9, %s563_s9, %s564_s10  }
   0xe   :  { %554 = dma.done.wait [#allocation3], 128  }
   0xf   :  { %555 = vsyncadd [#allocation3], 4294967168 }
  0x10   :  { %556 = dma.done.wait [#allocation6], 1280  }
  0x11   :  { %557 = vsyncadd [#allocation6], 4294966016 }
  0x12   :  { %558 = dma.done.wait [#allocation9], 1024  }
  0x13   :  { %559 = vsyncadd [#allocation9], 4294966272  ;;  %v399_v0 = vld [vmem:[#allocation5 + $0x8] sm:$0xff]  ;;  %v398_v1 = vld [vmem:[#allocation5] sm:$0xff]  ;;  %vm111_vm0 = vcmask 261120   ;;  %s568_s24 = smov [#allocation10]  }
  0x14   :  { %v407_v2 = vld [vmem:[#allocation7 + $0x38] sm:$0xff]  ;;  %121 = vmatpush.bf16.msra.mxu0 %v399_v0  ;;  %v89_v3 = vld [vmem:[#allocation2] sm:$0xff]  ;;  %v406_v5 = vld [vmem:[#allocation7 + $0x30] sm:$0xff]  ;;  %s311_s25 = sshll.u32 %s568_s24, 4  ;;  %s313_s27 = sshll.u32 %s640_s7, 4  ;;  %vm304_vm1 = vcmask 64512   ;;  %s312_s25 = int_to_ptr.vmem [resolvable:$true] %s311_s25  ;;  %s314_s27 = int_to_ptr.hbm [resolvable:$true] %s313_s27 }
  0x15   :  { %203 = vmatpush.bf16.msra.mxu1 %v407_v2  ;;  %v90_v4 = vpack.c.bf16 %v89_v3, %v89_v3  ;;  %v405_v6 = vld [vmem:[#allocation7 + $0x28] sm:$0xff]  ;;  %v404_v7 = vld [vmem:[#allocation7 + $0x20] sm:$0xff]  ;;  %v403_v8 = vld [vmem:[#allocation7 + $0x18] sm:$0xff] }
  0x16   :  { %v402_v9 = vld [vmem:[#allocation7 + $0x10] sm:$0xff]  ;;  %v401_v10 = vld [vmem:[#allocation7 + $0x8] sm:$0xff]  ;;  %v400_v11 = vld [vmem:[#allocation7] sm:$0xff] }
  0x17   :  { %v415_v12 = vld [vmem:[#allocation8 + $0x38] sm:$0xff]  ;;  %v423_v13 = vld [vmem:[%s635_s2] ss:$0 sm:$0xff]  ;;  %v414_v24 = vld [vmem:[#allocation8 + $0x30] sm:$0xff] }
  0x18   :  { %122 = vmatpush.bf16.msra.mxu0 %v398_v1  ;;  %291 = vmatpush.bf16.msra.mxu2 %v415_v12  ;;  %v413_v25 = vld [vmem:[#allocation8 + $0x28] sm:$0xff]  ;;  %v412_v26 = vld [vmem:[#allocation8 + $0x20] sm:$0xff]  ;;  %v411_v27 = vld [vmem:[#allocation8 + $0x18] sm:$0xff] }
  0x19   :  { %204 = vmatpush.bf16.msra.mxu1 %v406_v5  ;;  %v410_v28 = vld [vmem:[#allocation8 + $0x10] sm:$0xff]  ;;  %v409_v29 = vld [vmem:[#allocation8 + $0x8] sm:$0xff]  ;;  %v408_v30 = vld [vmem:[#allocation8] sm:$0xff] }
  0x1a   :  { %v424_v31 = vld [vmem:[%s637_s4] ss:$0 sm:$0xff] }
  0x1b   :  { %333 = vmatmul.msk.bf16.vlgmr.msra.gmra.mxu0 %vm111_vm0, %v90_v4  ;;  %v425_v42 = vld [vmem:[%s639_s6] ss:$0 sm:$0xff] }
  0x1c   :  { %292 = vmatpush.bf16.msra.mxu2 %v414_v24 }
  0x1d   :  { %205 = vmatpush.bf16.msra.mxu1 %v405_v6 }
  0x20   :  { %293 = vmatpush.bf16.msra.mxu2 %v413_v25 }
  0x21   :  { %206 = vmatpush.bf16.msra.mxu1 %v404_v7 }
  0x24   :  { %294 = vmatpush.bf16.msra.mxu2 %v412_v26 }
  0x25   :  { %207 = vmatpush.bf16.msra.mxu1 %v403_v8 }
  0x28   :  { %295 = vmatpush.bf16.msra.mxu2 %v411_v27 }
  0x29   :  { %208 = vmatpush.bf16.msra.mxu1 %v402_v9 }
  0x2c   :  { %296 = vmatpush.bf16.msra.mxu2 %v410_v28 }
  0x2d   :  { %209 = vmatpush.bf16.msra.mxu1 %v401_v10 }
  0x30   :  { %297 = vmatpush.bf16.msra.mxu2 %v409_v29 }
  0x31   :  { %210 = vmatpush.bf16.msra.mxu1 %v400_v11 }
  0x34   :  { %298 = vmatpush.bf16.msra.mxu2 %v408_v30 }
  0x98   :  { %v124_v14 = vpop.f32.mrf.mxu0 }
  0x99   :  { %v125_v15 = vadd.f32 %v423_v13, %v124_v14 }
  0x9b   :  { %v128_v16 = vsub.f32 0.0, %v125_v15 }
  0x9d   :  { %v129_v17 = vmul.f32 1.442695, %v128_v16 }
  0x9f   :  { %426 = vpow2.f32 %v129_v17 }
  0xa0   :  { %v126_v18 = vpop.f32.mrf.mxu0 }
  0xa5   :  { %v427_v19 = vpop.eup %426 }
  0xa6   :  { %v131_v20 = vadd.f32 1.0, %v427_v19 }
  0xa8   :  { %428 = vrcp.f32 %v131_v20 }
  0xae   :  { %v429_v21 = vpop.eup %428 }
  0xaf   :  { %v133_v22 = vmul.f32 %v429_v21, %v125_v15 }
  0xb1   :  { %v134_v23 = vpack.c.bf16 %v133_v22, %v133_v22 }
  0xb3   :  { %211 = vmatmul.bf16.vlgmr.msra.gmra.mxu1 %v134_v23 }
 0x130   :  { %v212_v32 = vpop.f32.mrf.mxu1 }
 0x131   :  { %v213_v33 = vadd.f32 %v424_v31, %v212_v32 }
 0x133   :  { %v216_v34 = vsub.f32 0.0, %v213_v33 }
 0x135   :  { %v217_v35 = vmul.f32 1.442695, %v216_v34 }
 0x137   :  { %430 = vpow2.f32 %v217_v35 }
 0x138   :  { %v214_v36 = vpop.f32.mrf.mxu1 }
 0x13d   :  { %v431_v37 = vpop.eup %430 }
 0x13e   :  { %v219_v38 = vadd.f32 1.0, %v431_v37 }
 0x140   :  { %432 = vrcp.f32 %v219_v38 }
 0x146   :  { %v433_v39 = vpop.eup %432 }
 0x147   :  { %v221_v40 = vmul.f32 %v433_v39, %v213_v33 }
 0x149   :  { %v222_v41 = vpack.c.bf16 %v221_v40, %v221_v40 }
 0x14b   :  { %299 = vmatmul.bf16.vlgmr.msra.gmra.mxu2 %v222_v41 }
 0x1ce   :  { %v300_v43 = vpop.f32.mrf.mxu2 }
 0x1cf   :  { %v301_v44 = vadd.f32 %v425_v42, %v300_v43 }
 0x1d1   :  { %305 = vst.msk [vmem:[#allocation10] sm:$0xff] %vm304_vm1, %v301_v44 }
 0x1d2   :  { %316 = dma.vmem_to_hbm [thread:$0]  %s312_s25, 128, %s314_s27, [#allocation4]  }
 0x1d6   :  { %v302_v45 = vpop.f32.mrf.mxu2 }
 0x1d7   :  { %560 = dma.done.wait [#allocation4], 128  }
 0x1d8   :  { %561 = vsyncadd [#allocation4], 4294967168 }
 0x1d9   :  { %321 = vsyncpa [#allocation3], 1 }
 0x1da   :  { %322 = vsyncpa [#allocation6], 1 }
 0x1db   :  { %323 = vsyncpa [#allocation9], 1 }
 0x1dc   :  { %324 = vsyncpa [#allocation4], 1 }

</bundles_post_ra>
